<compile_context>
chip_gen: v7x
topology: tpu7x:2x2x1
jax: 0.10.0
libtpu: 0.0.40
codegen_flags: <defaults>
</compile_context>

<pallas_src>
import jax
import jax.numpy as jnp
from jax.experimental import pallas as pl
from jax.experimental.pallas import tpu as pltpu

OUT_LANES = 128  # lane-dense output slab width


def _lstm_mlp_kernel(x_ref,      # (B, T, D)   raw inputs
                     wih_ref,    # (D, 4H)     W_ih^T
                     whh_ref,    # (H, 4H)     W_hh^T
                     b_ref,      # (1, 4H)     b_ih + b_hh
                     wmlp_ref,   # (1, H)      MLP weight row
                     bmlp_ref,   # (1,) SMEM   MLP bias scalar
                     out_ref):   # (B, T, OUT_LANES) lane-dense output slab
    B, T, D = x_ref.shape
    H = whh_ref.shape[0]
    G = whh_ref.shape[1]  # 4*H

    # ---- Prologue (off the serial path): input projection for all timesteps.
    x2d = x_ref[...].reshape(B * T, D)                      # rows ordered (b, t)
    xproj = (jnp.dot(x2d, wih_ref[...],
                     preferred_element_type=jnp.float32)
             + b_ref[...])                                  # (B*T, 4H)
    xproj = xproj.reshape(B, T, G)                          # (B, T, 4H)

    whh = whh_ref[...]     # (H, 4H) = 64 KiB -> safe to keep resident
    wmlp = wmlp_ref[...]   # (1, H)
    bmlp = bmlp_ref[0]     # scalar from SMEM

    h = jnp.zeros((B, H), jnp.float32)
    c = jnp.zeros((B, H), jnp.float32)
    hs = []

    # ---- Fully unrolled serial recurrence: one (B,H)x(H,4H) MXU matmul/step.
    for t in range(T):
        gates = xproj[:, t, :] + jnp.dot(h, whh,
                                         preferred_element_type=jnp.float32)
        # PyTorch gate order: i, f, g, o.
        i = jax.nn.sigmoid(gates[:, 0 * H:1 * H])
        f = jax.nn.sigmoid(gates[:, 1 * H:2 * H])
        g = jnp.tanh(gates[:, 2 * H:3 * H])
        o = jax.nn.sigmoid(gates[:, 3 * H:4 * H])
        c = f * c + i * g
        h = o * jnp.tanh(c)
        hs.append(h)

    # ---- Epilogue: fused MLP head for all (b, t) at once, off the recurrence.
    hs_all = jnp.stack(hs, axis=1)                          # (B, T, H)
    y = jnp.tanh(jnp.sum(hs_all * wmlp[None], axis=-1, keepdims=True)
                 + bmlp)                                    # (B, T, 1)
    # Single unmasked lane-dense store (column 0 carries the result).
    out_ref[...] = jnp.broadcast_to(y, out_ref.shape)


@jax.jit
def lstm_mlp_forward(x, w_ih, w_hh, b_ih, b_hh, w_mlp, b_mlp):
    """x: (B, T, D) float32.  Returns (B, T, 1) float32 (PyTorch semantics)."""
    B, T, _ = x.shape
    f32 = jnp.float32

    wih_t = jnp.transpose(w_ih).astype(f32)            # (D, 4H)
    whh_t = jnp.transpose(w_hh).astype(f32)            # (H, 4H)
    b = (b_ih + b_hh).astype(f32)[None, :]             # (1, 4H)
    wmlp = w_mlp.astype(f32)                            # (1, H)
    bmlp = b_mlp.reshape(1).astype(f32)                 # (1,)

    vmem = pltpu.MemorySpace.VMEM
    smem = pltpu.MemorySpace.SMEM
    out_slab = pl.pallas_call(
        _lstm_mlp_kernel,
        out_shape=jax.ShapeDtypeStruct((B, T, OUT_LANES), f32),
        in_specs=[
            pl.BlockSpec(memory_space=vmem),   # x       (~1.3 KB)
            pl.BlockSpec(memory_space=vmem),   # W_ih^T  (~20 KB)
            pl.BlockSpec(memory_space=vmem),   # W_hh^T  (~64 KB)
            pl.BlockSpec(memory_space=vmem),   # bias row
            pl.BlockSpec(memory_space=vmem),   # w_mlp
            pl.BlockSpec(memory_space=smem),   # b_mlp scalar
        ],
        out_specs=pl.BlockSpec(memory_space=vmem),
    )(x.astype(f32), wih_t, whh_t, b, wmlp, bmlp)

    return out_slab[..., :1]                             # (B, T, 1)


def _reference(x, w_ih, w_hh, b_ih, b_hh, w_mlp, b_mlp):
    """Pure-JAX reference matching torch.nn.LSTM + Linear + Tanh."""
    B, T, _ = x.shape
    H = w_hh.shape[1]
    h = jnp.zeros((B, H), jnp.float32)
    c = jnp.zeros((B, H), jnp.float32)
    outs = []
    for t in range(T):
        gates = x[:, t, :] @ w_ih.T + h @ w_hh.T + b_ih + b_hh
        i = jax.nn.sigmoid(gates[:, 0 * H:1 * H])
        f = jax.nn.sigmoid(gates[:, 1 * H:2 * H])
        g = jnp.tanh(gates[:, 2 * H:3 * H])
        o = jax.nn.sigmoid(gates[:, 3 * H:4 * H])
        c = f * c + i * g
        h = o * jnp.tanh(c)
        outs.append(h)
    hs = jnp.stack(outs, axis=1)                             # (B, T, H)
    mlp = jnp.tanh(hs.reshape(B * T, H) @ w_mlp.T + b_mlp)   # (B*T, 1)
    return mlp.reshape(B, T, 1)


if __name__ == "__main__":
    INPUT_SIZE, HIDDEN_SIZE = 20, 64
    B, T = 2, 8

    key = jax.random.PRNGKey(0)
    ks = jax.random.split(key, 8)
    bound = 1.0 / jnp.sqrt(HIDDEN_SIZE)

    x = jax.random.normal(ks[0], (B, T, INPUT_SIZE), jnp.float32)
    w_ih = jax.random.uniform(ks[1], (4 * HIDDEN_SIZE, INPUT_SIZE),
                              jnp.float32, -bound, bound)
    w_hh = jax.random.uniform(ks[2], (4 * HIDDEN_SIZE, HIDDEN_SIZE),
                              jnp.float32, -bound, bound)
    b_ih = jax.random.uniform(ks[3], (4 * HIDDEN_SIZE,), jnp.float32, -bound, bound)
    b_hh = jax.random.uniform(ks[4], (4 * HIDDEN_SIZE,), jnp.float32, -bound, bound)
    w_mlp = jax.random.uniform(ks[5], (1, HIDDEN_SIZE), jnp.float32, -bound, bound)
    b_mlp = jax.random.uniform(ks[6], (1,), jnp.float32, -bound, bound)

    out = lstm_mlp_forward(x, w_ih, w_hh, b_ih, b_hh, w_mlp, b_mlp)
    out = jax.block_until_ready(out)

    ref = _reference(x, w_ih, w_hh, b_ih, b_hh, w_mlp, b_mlp)
    assert out.shape == (B, T, 1), out.shape
    assert jnp.allclose(out, ref, atol=1e-4, rtol=1e-4), \
        float(jnp.max(jnp.abs(out - ref)))

    print("KERNEL_OK")
</pallas_src>

<mosaic_0001>
module attributes {stable_mosaic.version = 11 : i64} {
  func.func @_lstm_mlp_kernel(%arg0: memref<2x8x20xf32, #tpu.memory_space<vmem>>, %arg1: memref<20x256xf32, #tpu.memory_space<vmem>>, %arg2: memref<64x256xf32, #tpu.memory_space<vmem>>, %arg3: memref<1x256xf32, #tpu.memory_space<vmem>>, %arg4: memref<1x64xf32, #tpu.memory_space<vmem>>, %arg5: memref<1xf32, #tpu.memory_space<smem>>, %arg6: memref<2x8x128xf32, #tpu.memory_space<vmem>>) attributes {dimension_semantics = [], scalar_prefetch = 0 : i64, scratch_operands = 0 : i64, tpu.core_type = #tpu.core_type<tc>} {
    %c0 = arith.constant 0 : index
    %c0_0 = arith.constant 0 : index
    %c0_1 = arith.constant 0 : index
    %0 = vector.load %arg0[%c0, %c0_0, %c0_1] : memref<2x8x20xf32, #tpu.memory_space<vmem>>, vector<2x8x20xf32>
    %1 = vector.shape_cast %0 : vector<2x8x20xf32> to vector<16x20xf32>
    %c0_2 = arith.constant 0 : index
    %c0_3 = arith.constant 0 : index
    %2 = vector.load %arg1[%c0_2, %c0_3] : memref<20x256xf32, #tpu.memory_space<vmem>>, vector<20x256xf32>
    %cst = arith.constant dense<0.000000e+00> : vector<16x256xf32>
    %3 = tpu.matmul %1, %2, %cst {dimension_numbers = #tpu.dot_dimension_numbers<[1], [0], [0], [1], [0, 0, 1, 1], [], []>} : vector<16x20xf32>, vector<20x256xf32>, vector<16x256xf32> -> vector<16x256xf32>
    %c0_4 = arith.constant 0 : index
    %c0_5 = arith.constant 0 : index
    %4 = vector.load %arg3[%c0_4, %c0_5] : memref<1x256xf32, #tpu.memory_space<vmem>>, vector<1x256xf32>
    %5 = vector.broadcast %4 : vector<1x256xf32> to vector<16x256xf32>
    %6 = arith.addf %3, %5 : vector<16x256xf32>
    %7 = vector.shape_cast %6 : vector<16x256xf32> to vector<2x8x256xf32>
    %c0_6 = arith.constant 0 : index
    %c0_7 = arith.constant 0 : index
    %8 = vector.load %arg2[%c0_6, %c0_7] : memref<64x256xf32, #tpu.memory_space<vmem>>, vector<64x256xf32>
    %c0_8 = arith.constant 0 : index
    %c0_9 = arith.constant 0 : index
    %9 = vector.load %arg4[%c0_8, %c0_9] : memref<1x64xf32, #tpu.memory_space<vmem>>, vector<1x64xf32>
    %c0_10 = arith.constant 0 : index
    %10 = memref.load %arg5[%c0_10] : memref<1xf32, #tpu.memory_space<smem>>
    %cst_11 = arith.constant 0.000000e+00 : f32
    %11 = vector.broadcast %cst_11 : f32 to vector<2x64xf32>
    %cst_12 = arith.constant 0.000000e+00 : f32
    %12 = vector.broadcast %cst_12 : f32 to vector<2x64xf32>
    %13 = vector.extract_strided_slice %7 {offsets = [0, 0, 0], sizes = [2, 1, 256], strides = [1, 1, 1]} : vector<2x8x256xf32> to vector<2x1x256xf32>
    %14 = vector.shape_cast %13 : vector<2x1x256xf32> to vector<2x256xf32>
    %cst_13 = arith.constant dense<0.000000e+00> : vector<2x256xf32>
    %15 = tpu.matmul %11, %8, %cst_13 {dimension_numbers = #tpu.dot_dimension_numbers<[1], [0], [0], [1], [0, 0, 1, 1], [], []>} : vector<2x64xf32>, vector<64x256xf32>, vector<2x256xf32> -> vector<2x256xf32>
    %16 = arith.addf %14, %15 : vector<2x256xf32>
    %17 = vector.extract_strided_slice %16 {offsets = [0, 0], sizes = [2, 64], strides = [1, 1]} : vector<2x256xf32> to vector<2x64xf32>
    %18 = arith.negf %17 : vector<2x64xf32>
    %19 = math.exp %18 : vector<2x64xf32>
    %cst_14 = arith.constant 1.000000e+00 : f32
    %20 = vector.broadcast %cst_14 : f32 to vector<2x64xf32>
    %21 = arith.addf %20, %19 : vector<2x64xf32>
    %22 = arith.divf %20, %21 : vector<2x64xf32>
    %23 = vector.extract_strided_slice %16 {offsets = [0, 64], sizes = [2, 64], strides = [1, 1]} : vector<2x256xf32> to vector<2x64xf32>
    %24 = arith.negf %23 : vector<2x64xf32>
    %25 = math.exp %24 : vector<2x64xf32>
    %cst_15 = arith.constant 1.000000e+00 : f32
    %26 = vector.broadcast %cst_15 : f32 to vector<2x64xf32>
    %27 = arith.addf %26, %25 : vector<2x64xf32>
    %28 = arith.divf %26, %27 : vector<2x64xf32>
    %29 = vector.extract_strided_slice %16 {offsets = [0, 128], sizes = [2, 64], strides = [1, 1]} : vector<2x256xf32> to vector<2x64xf32>
    %30 = math.tanh %29 : vector<2x64xf32>
    %31 = vector.extract_strided_slice %16 {offsets = [0, 192], sizes = [2, 64], strides = [1, 1]} : vector<2x256xf32> to vector<2x64xf32>
    %32 = arith.negf %31 : vector<2x64xf32>
    %33 = math.exp %32 : vector<2x64xf32>
    %cst_16 = arith.constant 1.000000e+00 : f32
    %34 = vector.broadcast %cst_16 : f32 to vector<2x64xf32>
    %35 = arith.addf %34, %33 : vector<2x64xf32>
    %36 = arith.divf %34, %35 : vector<2x64xf32>
    %37 = arith.mulf %28, %12 : vector<2x64xf32>
    %38 = arith.mulf %22, %30 : vector<2x64xf32>
    %39 = arith.addf %37, %38 : vector<2x64xf32>
    %40 = math.tanh %39 : vector<2x64xf32>
    %41 = arith.mulf %36, %40 : vector<2x64xf32>
    %42 = vector.extract_strided_slice %7 {offsets = [0, 1, 0], sizes = [2, 1, 256], strides = [1, 1, 1]} : vector<2x8x256xf32> to vector<2x1x256xf32>
    %43 = vector.shape_cast %42 : vector<2x1x256xf32> to vector<2x256xf32>
    %cst_17 = arith.constant dense<0.000000e+00> : vector<2x256xf32>
    %44 = tpu.matmul %41, %8, %cst_17 {dimension_numbers = #tpu.dot_dimension_numbers<[1], [0], [0], [1], [0, 0, 1, 1], [], []>} : vector<2x64xf32>, vector<64x256xf32>, vector<2x256xf32> -> vector<2x256xf32>
    %45 = arith.addf %43, %44 : vector<2x256xf32>
    %46 = vector.extract_strided_slice %45 {offsets = [0, 0], sizes = [2, 64], strides = [1, 1]} : vector<2x256xf32> to vector<2x64xf32>
    %47 = arith.negf %46 : vector<2x64xf32>
    %48 = math.exp %47 : vector<2x64xf32>
    %cst_18 = arith.constant 1.000000e+00 : f32
    %49 = vector.broadcast %cst_18 : f32 to vector<2x64xf32>
    %50 = arith.addf %49, %48 : vector<2x64xf32>
    %51 = arith.divf %49, %50 : vector<2x64xf32>
    %52 = vector.extract_strided_slice %45 {offsets = [0, 64], sizes = [2, 64], strides = [1, 1]} : vector<2x256xf32> to vector<2x64xf32>
    %53 = arith.negf %52 : vector<2x64xf32>
    %54 = math.exp %53 : vector<2x64xf32>
    %cst_19 = arith.constant 1.000000e+00 : f32
    %55 = vector.broadcast %cst_19 : f32 to vector<2x64xf32>
    %56 = arith.addf %55, %54 : vector<2x64xf32>
    %57 = arith.divf %55, %56 : vector<2x64xf32>
    %58 = vector.extract_strided_slice %45 {offsets = [0, 128], sizes = [2, 64], strides = [1, 1]} : vector<2x256xf32> to vector<2x64xf32>
    %59 = math.tanh %58 : vector<2x64xf32>
    %60 = vector.extract_strided_slice %45 {offsets = [0, 192], sizes = [2, 64], strides = [1, 1]} : vector<2x256xf32> to vector<2x64xf32>
    %61 = arith.negf %60 : vector<2x64xf32>
    %62 = math.exp %61 : vector<2x64xf32>
    %cst_20 = arith.constant 1.000000e+00 : f32
    %63 = vector.broadcast %cst_20 : f32 to vector<2x64xf32>
    %64 = arith.addf %63, %62 : vector<2x64xf32>
    %65 = arith.divf %63, %64 : vector<2x64xf32>
    %66 = arith.mulf %57, %39 : vector<2x64xf32>
    %67 = arith.mulf %51, %59 : vector<2x64xf32>
    %68 = arith.addf %66, %67 : vector<2x64xf32>
    %69 = math.tanh %68 : vector<2x64xf32>
    %70 = arith.mulf %65, %69 : vector<2x64xf32>
    %71 = vector.extract_strided_slice %7 {offsets = [0, 2, 0], sizes = [2, 1, 256], strides = [1, 1, 1]} : vector<2x8x256xf32> to vector<2x1x256xf32>
    %72 = vector.shape_cast %71 : vector<2x1x256xf32> to vector<2x256xf32>
    %cst_21 = arith.constant dense<0.000000e+00> : vector<2x256xf32>
    %73 = tpu.matmul %70, %8, %cst_21 {dimension_numbers = #tpu.dot_dimension_numbers<[1], [0], [0], [1], [0, 0, 1, 1], [], []>} : vector<2x64xf32>, vector<64x256xf32>, vector<2x256xf32> -> vector<2x256xf32>
    %74 = arith.addf %72, %73 : vector<2x256xf32>
    %75 = vector.extract_strided_slice %74 {offsets = [0, 0], sizes = [2, 64], strides = [1, 1]} : vector<2x256xf32> to vector<2x64xf32>
    %76 = arith.negf %75 : vector<2x64xf32>
    %77 = math.exp %76 : vector<2x64xf32>
    %cst_22 = arith.constant 1.000000e+00 : f32
    %78 = vector.broadcast %cst_22 : f32 to vector<2x64xf32>
    %79 = arith.addf %78, %77 : vector<2x64xf32>
    %80 = arith.divf %78, %79 : vector<2x64xf32>
    %81 = vector.extract_strided_slice %74 {offsets = [0, 64], sizes = [2, 64], strides = [1, 1]} : vector<2x256xf32> to vector<2x64xf32>
    %82 = arith.negf %81 : vector<2x64xf32>
    %83 = math.exp %82 : vector<2x64xf32>
    %cst_23 = arith.constant 1.000000e+00 : f32
    %84 = vector.broadcast %cst_23 : f32 to vector<2x64xf32>
    %85 = arith.addf %84, %83 : vector<2x64xf32>
    %86 = arith.divf %84, %85 : vector<2x64xf32>
    %87 = vector.extract_strided_slice %74 {offsets = [0, 128], sizes = [2, 64], strides = [1, 1]} : vector<2x256xf32> to vector<2x64xf32>
    %88 = math.tanh %87 : vector<2x64xf32>
    %89 = vector.extract_strided_slice %74 {offsets = [0, 192], sizes = [2, 64], strides = [1, 1]} : vector<2x256xf32> to vector<2x64xf32>
    %90 = arith.negf %89 : vector<2x64xf32>
    %91 = math.exp %90 : vector<2x64xf32>
    %cst_24 = arith.constant 1.000000e+00 : f32
    %92 = vector.broadcast %cst_24 : f32 to vector<2x64xf32>
    %93 = arith.addf %92, %91 : vector<2x64xf32>
    %94 = arith.divf %92, %93 : vector<2x64xf32>
    %95 = arith.mulf %86, %68 : vector<2x64xf32>
    %96 = arith.mulf %80, %88 : vector<2x64xf32>
    %97 = arith.addf %95, %96 : vector<2x64xf32>
    %98 = math.tanh %97 : vector<2x64xf32>
    %99 = arith.mulf %94, %98 : vector<2x64xf32>
    %100 = vector.extract_strided_slice %7 {offsets = [0, 3, 0], sizes = [2, 1, 256], strides = [1, 1, 1]} : vector<2x8x256xf32> to vector<2x1x256xf32>
    %101 = vector.shape_cast %100 : vector<2x1x256xf32> to vector<2x256xf32>
    %cst_25 = arith.constant dense<0.000000e+00> : vector<2x256xf32>
    %102 = tpu.matmul %99, %8, %cst_25 {dimension_numbers = #tpu.dot_dimension_numbers<[1], [0], [0], [1], [0, 0, 1, 1], [], []>} : vector<2x64xf32>, vector<64x256xf32>, vector<2x256xf32> -> vector<2x256xf32>
    %103 = arith.addf %101, %102 : vector<2x256xf32>
    %104 = vector.extract_strided_slice %103 {offsets = [0, 0], sizes = [2, 64], strides = [1, 1]} : vector<2x256xf32> to vector<2x64xf32>
    %105 = arith.negf %104 : vector<2x64xf32>
    %106 = math.exp %105 : vector<2x64xf32>
    %cst_26 = arith.constant 1.000000e+00 : f32
    %107 = vector.broadcast %cst_26 : f32 to vector<2x64xf32>
    %108 = arith.addf %107, %106 : vector<2x64xf32>
    %109 = arith.divf %107, %108 : vector<2x64xf32>
    %110 = vector.extract_strided_slice %103 {offsets = [0, 64], sizes = [2, 64], strides = [1, 1]} : vector<2x256xf32> to vector<2x64xf32>
    %111 = arith.negf %110 : vector<2x64xf32>
    %112 = math.exp %111 : vector<2x64xf32>
    %cst_27 = arith.constant 1.000000e+00 : f32
    %113 = vector.broadcast %cst_27 : f32 to vector<2x64xf32>
    %114 = arith.addf %113, %112 : vector<2x64xf32>
    %115 = arith.divf %113, %114 : vector<2x64xf32>
    %116 = vector.extract_strided_slice %103 {offsets = [0, 128], sizes = [2, 64], strides = [1, 1]} : vector<2x256xf32> to vector<2x64xf32>
    %117 = math.tanh %116 : vector<2x64xf32>
    %118 = vector.extract_strided_slice %103 {offsets = [0, 192], sizes = [2, 64], strides = [1, 1]} : vector<2x256xf32> to vector<2x64xf32>
    %119 = arith.negf %118 : vector<2x64xf32>
    %120 = math.exp %119 : vector<2x64xf32>
    %cst_28 = arith.constant 1.000000e+00 : f32
    %121 = vector.broadcast %cst_28 : f32 to vector<2x64xf32>
    %122 = arith.addf %121, %120 : vector<2x64xf32>
    %123 = arith.divf %121, %122 : vector<2x64xf32>
    %124 = arith.mulf %115, %97 : vector<2x64xf32>
    %125 = arith.mulf %109, %117 : vector<2x64xf32>
    %126 = arith.addf %124, %125 : vector<2x64xf32>
    %127 = math.tanh %126 : vector<2x64xf32>
    %128 = arith.mulf %123, %127 : vector<2x64xf32>
    %129 = vector.extract_strided_slice %7 {offsets = [0, 4, 0], sizes = [2, 1, 256], strides = [1, 1, 1]} : vector<2x8x256xf32> to vector<2x1x256xf32>
    %130 = vector.shape_cast %129 : vector<2x1x256xf32> to vector<2x256xf32>
    %cst_29 = arith.constant dense<0.000000e+00> : vector<2x256xf32>
    %131 = tpu.matmul %128, %8, %cst_29 {dimension_numbers = #tpu.dot_dimension_numbers<[1], [0], [0], [1], [0, 0, 1, 1], [], []>} : vector<2x64xf32>, vector<64x256xf32>, vector<2x256xf32> -> vector<2x256xf32>
    %132 = arith.addf %130, %131 : vector<2x256xf32>
    %133 = vector.extract_strided_slice %132 {offsets = [0, 0], sizes = [2, 64], strides = [1, 1]} : vector<2x256xf32> to vector<2x64xf32>
    %134 = arith.negf %133 : vector<2x64xf32>
    %135 = math.exp %134 : vector<2x64xf32>
    %cst_30 = arith.constant 1.000000e+00 : f32
    %136 = vector.broadcast %cst_30 : f32 to vector<2x64xf32>
    %137 = arith.addf %136, %135 : vector<2x64xf32>
    %138 = arith.divf %136, %137 : vector<2x64xf32>
    %139 = vector.extract_strided_slice %132 {offsets = [0, 64], sizes = [2, 64], strides = [1, 1]} : vector<2x256xf32> to vector<2x64xf32>
    %140 = arith.negf %139 : vector<2x64xf32>
    %141 = math.exp %140 : vector<2x64xf32>
    %cst_31 = arith.constant 1.000000e+00 : f32
    %142 = vector.broadcast %cst_31 : f32 to vector<2x64xf32>
    %143 = arith.addf %142, %141 : vector<2x64xf32>
    %144 = arith.divf %142, %143 : vector<2x64xf32>
    %145 = vector.extract_strided_slice %132 {offsets = [0, 128], sizes = [2, 64], strides = [1, 1]} : vector<2x256xf32> to vector<2x64xf32>
    %146 = math.tanh %145 : vector<2x64xf32>
    %147 = vector.extract_strided_slice %132 {offsets = [0, 192], sizes = [2, 64], strides = [1, 1]} : vector<2x256xf32> to vector<2x64xf32>
    %148 = arith.negf %147 : vector<2x64xf32>
    %149 = math.exp %148 : vector<2x64xf32>
    %cst_32 = arith.constant 1.000000e+00 : f32
    %150 = vector.broadcast %cst_32 : f32 to vector<2x64xf32>
    %151 = arith.addf %150, %149 : vector<2x64xf32>
    %152 = arith.divf %150, %151 : vector<2x64xf32>
    %153 = arith.mulf %144, %126 : vector<2x64xf32>
    %154 = arith.mulf %138, %146 : vector<2x64xf32>
    %155 = arith.addf %153, %154 : vector<2x64xf32>
    %156 = math.tanh %155 : vector<2x64xf32>
    %157 = arith.mulf %152, %156 : vector<2x64xf32>
    %158 = vector.extract_strided_slice %7 {offsets = [0, 5, 0], sizes = [2, 1, 256], strides = [1, 1, 1]} : vector<2x8x256xf32> to vector<2x1x256xf32>
    %159 = vector.shape_cast %158 : vector<2x1x256xf32> to vector<2x256xf32>
    %cst_33 = arith.constant dense<0.000000e+00> : vector<2x256xf32>
    %160 = tpu.matmul %157, %8, %cst_33 {dimension_numbers = #tpu.dot_dimension_numbers<[1], [0], [0], [1], [0, 0, 1, 1], [], []>} : vector<2x64xf32>, vector<64x256xf32>, vector<2x256xf32> -> vector<2x256xf32>
    %161 = arith.addf %159, %160 : vector<2x256xf32>
    %162 = vector.extract_strided_slice %161 {offsets = [0, 0], sizes = [2, 64], strides = [1, 1]} : vector<2x256xf32> to vector<2x64xf32>
    %163 = arith.negf %162 : vector<2x64xf32>
    %164 = math.exp %163 : vector<2x64xf32>
    %cst_34 = arith.constant 1.000000e+00 : f32
    %165 = vector.broadcast %cst_34 : f32 to vector<2x64xf32>
    %166 = arith.addf %165, %164 : vector<2x64xf32>
    %167 = arith.divf %165, %166 : vector<2x64xf32>
    %168 = vector.extract_strided_slice %161 {offsets = [0, 64], sizes = [2, 64], strides = [1, 1]} : vector<2x256xf32> to vector<2x64xf32>
    %169 = arith.negf %168 : vector<2x64xf32>
    %170 = math.exp %169 : vector<2x64xf32>
    %cst_35 = arith.constant 1.000000e+00 : f32
    %171 = vector.broadcast %cst_35 : f32 to vector<2x64xf32>
    %172 = arith.addf %171, %170 : vector<2x64xf32>
    %173 = arith.divf %171, %172 : vector<2x64xf32>
    %174 = vector.extract_strided_slice %161 {offsets = [0, 128], sizes = [2, 64], strides = [1, 1]} : vector<2x256xf32> to vector<2x64xf32>
    %175 = math.tanh %174 : vector<2x64xf32>
    %176 = vector.extract_strided_slice %161 {offsets = [0, 192], sizes = [2, 64], strides = [1, 1]} : vector<2x256xf32> to vector<2x64xf32>
    %177 = arith.negf %176 : vector<2x64xf32>
    %178 = math.exp %177 : vector<2x64xf32>
    %cst_36 = arith.constant 1.000000e+00 : f32
    %179 = vector.broadcast %cst_36 : f32 to vector<2x64xf32>
    %180 = arith.addf %179, %178 : vector<2x64xf32>
    %181 = arith.divf %179, %180 : vector<2x64xf32>
    %182 = arith.mulf %173, %155 : vector<2x64xf32>
    %183 = arith.mulf %167, %175 : vector<2x64xf32>
    %184 = arith.addf %182, %183 : vector<2x64xf32>
    %185 = math.tanh %184 : vector<2x64xf32>
    %186 = arith.mulf %181, %185 : vector<2x64xf32>
    %187 = vector.extract_strided_slice %7 {offsets = [0, 6, 0], sizes = [2, 1, 256], strides = [1, 1, 1]} : vector<2x8x256xf32> to vector<2x1x256xf32>
    %188 = vector.shape_cast %187 : vector<2x1x256xf32> to vector<2x256xf32>
    %cst_37 = arith.constant dense<0.000000e+00> : vector<2x256xf32>
    %189 = tpu.matmul %186, %8, %cst_37 {dimension_numbers = #tpu.dot_dimension_numbers<[1], [0], [0], [1], [0, 0, 1, 1], [], []>} : vector<2x64xf32>, vector<64x256xf32>, vector<2x256xf32> -> vector<2x256xf32>
    %190 = arith.addf %188, %189 : vector<2x256xf32>
    %191 = vector.extract_strided_slice %190 {offsets = [0, 0], sizes = [2, 64], strides = [1, 1]} : vector<2x256xf32> to vector<2x64xf32>
    %192 = arith.negf %191 : vector<2x64xf32>
    %193 = math.exp %192 : vector<2x64xf32>
    %cst_38 = arith.constant 1.000000e+00 : f32
    %194 = vector.broadcast %cst_38 : f32 to vector<2x64xf32>
    %195 = arith.addf %194, %193 : vector<2x64xf32>
    %196 = arith.divf %194, %195 : vector<2x64xf32>
    %197 = vector.extract_strided_slice %190 {offsets = [0, 64], sizes = [2, 64], strides = [1, 1]} : vector<2x256xf32> to vector<2x64xf32>
    %198 = arith.negf %197 : vector<2x64xf32>
    %199 = math.exp %198 : vector<2x64xf32>
    %cst_39 = arith.constant 1.000000e+00 : f32
    %200 = vector.broadcast %cst_39 : f32 to vector<2x64xf32>
    %201 = arith.addf %200, %199 : vector<2x64xf32>
    %202 = arith.divf %200, %201 : vector<2x64xf32>
    %203 = vector.extract_strided_slice %190 {offsets = [0, 128], sizes = [2, 64], strides = [1, 1]} : vector<2x256xf32> to vector<2x64xf32>
    %204 = math.tanh %203 : vector<2x64xf32>
    %205 = vector.extract_strided_slice %190 {offsets = [0, 192], sizes = [2, 64], strides = [1, 1]} : vector<2x256xf32> to vector<2x64xf32>
    %206 = arith.negf %205 : vector<2x64xf32>
    %207 = math.exp %206 : vector<2x64xf32>
    %cst_40 = arith.constant 1.000000e+00 : f32
    %208 = vector.broadcast %cst_40 : f32 to vector<2x64xf32>
    %209 = arith.addf %208, %207 : vector<2x64xf32>
    %210 = arith.divf %208, %209 : vector<2x64xf32>
    %211 = arith.mulf %202, %184 : vector<2x64xf32>
    %212 = arith.mulf %196, %204 : vector<2x64xf32>
    %213 = arith.addf %211, %212 : vector<2x64xf32>
    %214 = math.tanh %213 : vector<2x64xf32>
    %215 = arith.mulf %210, %214 : vector<2x64xf32>
    %216 = vector.extract_strided_slice %7 {offsets = [0, 7, 0], sizes = [2, 1, 256], strides = [1, 1, 1]} : vector<2x8x256xf32> to vector<2x1x256xf32>
    %217 = vector.shape_cast %216 : vector<2x1x256xf32> to vector<2x256xf32>
    %cst_41 = arith.constant dense<0.000000e+00> : vector<2x256xf32>
    %218 = tpu.matmul %215, %8, %cst_41 {dimension_numbers = #tpu.dot_dimension_numbers<[1], [0], [0], [1], [0, 0, 1, 1], [], []>} : vector<2x64xf32>, vector<64x256xf32>, vector<2x256xf32> -> vector<2x256xf32>
    %219 = arith.addf %217, %218 : vector<2x256xf32>
    %220 = vector.extract_strided_slice %219 {offsets = [0, 0], sizes = [2, 64], strides = [1, 1]} : vector<2x256xf32> to vector<2x64xf32>
    %221 = arith.negf %220 : vector<2x64xf32>
    %222 = math.exp %221 : vector<2x64xf32>
    %cst_42 = arith.constant 1.000000e+00 : f32
    %223 = vector.broadcast %cst_42 : f32 to vector<2x64xf32>
    %224 = arith.addf %223, %222 : vector<2x64xf32>
    %225 = arith.divf %223, %224 : vector<2x64xf32>
    %226 = vector.extract_strided_slice %219 {offsets = [0, 64], sizes = [2, 64], strides = [1, 1]} : vector<2x256xf32> to vector<2x64xf32>
    %227 = arith.negf %226 : vector<2x64xf32>
    %228 = math.exp %227 : vector<2x64xf32>
    %cst_43 = arith.constant 1.000000e+00 : f32
    %229 = vector.broadcast %cst_43 : f32 to vector<2x64xf32>
    %230 = arith.addf %229, %228 : vector<2x64xf32>
    %231 = arith.divf %229, %230 : vector<2x64xf32>
    %232 = vector.extract_strided_slice %219 {offsets = [0, 128], sizes = [2, 64], strides = [1, 1]} : vector<2x256xf32> to vector<2x64xf32>
    %233 = math.tanh %232 : vector<2x64xf32>
    %234 = vector.extract_strided_slice %219 {offsets = [0, 192], sizes = [2, 64], strides = [1, 1]} : vector<2x256xf32> to vector<2x64xf32>
    %235 = arith.negf %234 : vector<2x64xf32>
    %236 = math.exp %235 : vector<2x64xf32>
    %cst_44 = arith.constant 1.000000e+00 : f32
    %237 = vector.broadcast %cst_44 : f32 to vector<2x64xf32>
    %238 = arith.addf %237, %236 : vector<2x64xf32>
    %239 = arith.divf %237, %238 : vector<2x64xf32>
    %240 = arith.mulf %231, %213 : vector<2x64xf32>
    %241 = arith.mulf %225, %233 : vector<2x64xf32>
    %242 = arith.addf %240, %241 : vector<2x64xf32>
    %243 = math.tanh %242 : vector<2x64xf32>
    %244 = arith.mulf %239, %243 : vector<2x64xf32>
    %245 = vector.shape_cast %41 : vector<2x64xf32> to vector<2x1x64xf32>
    %246 = vector.shape_cast %70 : vector<2x64xf32> to vector<2x1x64xf32>
    %247 = vector.shape_cast %99 : vector<2x64xf32> to vector<2x1x64xf32>
    %248 = vector.shape_cast %128 : vector<2x64xf32> to vector<2x1x64xf32>
    %249 = vector.shape_cast %157 : vector<2x64xf32> to vector<2x1x64xf32>
    %250 = vector.shape_cast %186 : vector<2x64xf32> to vector<2x1x64xf32>
    %251 = vector.shape_cast %215 : vector<2x64xf32> to vector<2x1x64xf32>
    %252 = vector.shape_cast %244 : vector<2x64xf32> to vector<2x1x64xf32>
    %253 = tpu.concatenate %245, %246, %247, %248, %249, %250, %251, %252 in 1 : vector<2x1x64xf32>, vector<2x1x64xf32>, vector<2x1x64xf32>, vector<2x1x64xf32>, vector<2x1x64xf32>, vector<2x1x64xf32>, vector<2x1x64xf32>, vector<2x1x64xf32> -> vector<2x8x64xf32>
    %254 = vector.shape_cast %9 : vector<1x64xf32> to vector<1x1x64xf32>
    %255 = vector.broadcast %254 : vector<1x1x64xf32> to vector<2x8x64xf32>
    %256 = arith.mulf %253, %255 : vector<2x8x64xf32>
    %cst_45 = arith.constant dense<0.000000e+00> : vector<2x8xf32>
    %257 = vector.multi_reduction <add>, %256, %cst_45 [2] : vector<2x8x64xf32> to vector<2x8xf32>
    %258 = vector.shape_cast %257 : vector<2x8xf32> to vector<2x8x1xf32>
    %259 = vector.broadcast %10 : f32 to vector<2x8x1xf32>
    %260 = arith.addf %258, %259 : vector<2x8x1xf32>
    %261 = math.tanh %260 : vector<2x8x1xf32>
    %262 = vector.shape_cast %261 : vector<2x8x1xf32> to vector<2x8x1xf32>
    %263 = vector.broadcast %262 : vector<2x8x1xf32> to vector<2x8x128xf32>
    %c0_46 = arith.constant 0 : index
    %c0_47 = arith.constant 0 : index
    %c0_48 = arith.constant 0 : index
    %264 = vector.load %arg6[%c0_46, %c0_47, %c0_48] : memref<2x8x128xf32, #tpu.memory_space<vmem>>, vector<2x8x128xf32>
    tpu.vector_store %arg6[%c0_46, %c0_47, %c0_48], %263 {strides = array<i32>} : memref<2x8x128xf32, #tpu.memory_space<vmem>>, vector<2x8x128xf32>,
    return
  }
}

</mosaic_0001>

<bundles_post_ra>
// kernel: lstm_mlp_forward.1
= control target key start
LH: loop header
LB: loop body
LE: loop exit
PB: predicated region body
PF: predicated region fallthrough
CT: control target
= control target key end

     0   :  { %12 = vsyncpa [#allocation4], 0  ;;  %s2109_s0 = inlined_call_operand.vmem [shape: f32[2,8,20], index: 0, kind: input, shape index: {}]   ;;  %s2110_s1 = inlined_call_operand.hbm [shape: f32[20,256], index: 1, kind: input, shape index: {}]   ;;  %s2111_s2 = inlined_call_operand.hbm [shape: f32[64,256], index: 2, kind: input, shape index: {}]   ;;  %s2112_s3 = inlined_call_operand.vmem [shape: f32[1,256], index: 3, kind: input, shape index: {}]   ;;  %s2113_s4 = inlined_call_operand.vmem [shape: f32[1,64], index: 4, kind: input, shape index: {}]   ;;  %s2114_s5 = inlined_call_operand.<no memory space> [shape: f32[1], index: 5, kind: input, shape index: {}]   ;;  %s2115_s6 = inlined_call_operand.vmem [shape: f32[2,8,128], index: 6, kind: output, shape index: {}]  }
   0x1   :  { %13 = vsyncpa [#allocation6], 0  ;;  %s1800_s21 = smov [#allocation3]   ;;  %s1752_s25 = scalar_lea.hbm %s2110_s1, 768 }
   0x2   :  { %s21_s22 = sshll.u32 %s1800_s21, 4  ;;  %p1753_p0 = scmp.ne.s32.totalorder %s2110_s1, %s1752_s25  ;;  %s22_s22 = int_to_ptr.vmem [resolvable:$true] %s21_s22 }
   0x3   :  { %p1756_p1 = scmp.lt.u32.totalorder %s1752_s25, %s2110_s1 }
   0x5   :  { %p1758_p2 = pnand %p1756_p1, %p1753_p0 }
   0x7   :  { %1761 = shalt.err (!%p1758_p2)
}
   0x8   :  { %s1762_s30 = scalar_lea.vmem %s22_s22, 768  ;;  %p1767_p4 = scmp.lt.s32.totalorder %s22_s22, %s22_s22 }
   0x9   :  { %p1763_p3 = scmp.ne.s32.totalorder %s22_s22, %s1762_s30  ;;  %p1768_p5 = scmp.lt.s32.totalorder %s1762_s30, %s1762_s30 }
   0xb   :  { %p1769_p6 = por %p1768_p5, %p1767_p4 }
   0xd   :  { %p1770_p7 = pnand %p1769_p6, %p1763_p3 }
   0xf   :  { %1773 = shalt.err (!%p1770_p7)
}
  0x10   :  { %s1801_s7 = smov 256   ;;  %s1802_s8 = smov 16  }
  0x11   :  { %27 = dma.hbm_to_vmem [thread:$0]  %s2110_s1, 768, %s22_s22, [#allocation4], %s1801_s7, %s1801_s7, %s1802_s8  }
  0x12   :  { %s1803_s11 = smov [#allocation5]   ;;  %s1774_s15 = scalar_lea.hbm %s2111_s2, 2048 }
  0x13   :  { %s33_s12 = sshll.u32 %s1803_s11, 4  ;;  %p1775_p8 = scmp.ne.s32.totalorder %s2111_s2, %s1774_s15  ;;  %s34_s12 = int_to_ptr.vmem [resolvable:$true] %s33_s12 }
  0x14   :  { %p1778_p9 = scmp.lt.u32.totalorder %s1774_s15, %s2111_s2 }
  0x16   :  { %p1780_p10 = pnand %p1778_p9, %p1775_p8 }
  0x18   :  { %1783 = shalt.err (!%p1780_p10)
}
  0x19   :  { %s1784_s20 = scalar_lea.vmem %s34_s12, 2048  ;;  %p1789_p12 = scmp.lt.s32.totalorder %s34_s12, %s34_s12 }
  0x1a   :  { %p1785_p11 = scmp.ne.s32.totalorder %s34_s12, %s1784_s20  ;;  %p1790_p13 = scmp.lt.s32.totalorder %s1784_s20, %s1784_s20 }
  0x1c   :  { %p1791_p0 = por %p1790_p13, %p1789_p12 }
  0x1e   :  { %p1792_p1 = pnand %p1791_p0, %p1785_p11 }
  0x20   :  { %1795 = shalt.err (!%p1792_p1)
}
  0x21   :  { %39 = dma.hbm_to_vmem [thread:$0]  %s2111_s2, 2048, %s34_s12, [#allocation6], %s1801_s7, %s1801_s7, %s1802_s8  }
  0x22   :  { %1796 = dma.done.wait [#allocation4], 768  }
  0x23   :  { %1797 = vsyncadd [#allocation4], 4294966528 }
  0x24   :  { %1798 = dma.done.wait [#allocation6], 2048  }
  0x25   :  { %1799 = vsyncadd [#allocation6], 4294965248  ;;  %v1804_v0 = vmov 0.0   ;;  %v164_v1 = vld [vmem:[#allocation5 + $0x8] sm:$0xff]  ;;  %v166_v2 = vld [vmem:[#allocation5 + $0x18] sm:$0xff]  ;;  %vm79_vm0 = vcmask 1043456   ;;  %v62_v35 = vlaneseq }
  0x26   :  { %150 = vmatprep.mubr.f32.mxu0 %v1804_v0  ;;  %249 = vmatprep.mubr.f32.mxu1 %v1804_v0  ;;  %v163_v3 = vld [vmem:[#allocation5] sm:$0xff]  ;;  %v1867_v4 = vpack.c.bf16 %v166_v2, %v164_v1  ;;  %v165_v5 = vld [vmem:[#allocation5 + $0x10] sm:$0xff]  ;;  %v168_v6 = vld [vmem:[#allocation5 + $0x28] sm:$0xff]  ;;  %vm72_vm1 = vcmask 162816   ;;  %vm315_vm2 = vcmask 1041409   ;;  %vm181_vm3 = vcmask 523264  }
  0x27   :  { %v170_v7 = vld [vmem:[#allocation5 + $0x38] sm:$0xff]  ;;  %v1869_v8 = vpack.c.bf16 %v165_v5, %v163_v3  ;;  %v57_v11 = vld [vmem:[#allocation3 + $0x18] sm:$0xff]  ;;  %v167_v12 = vld [vmem:[#allocation5 + $0x20] sm:$0xff]  ;;  %v63_v36 = vshrl.u32 %v62_v35, 7  ;;  %vm1317_vm4 = vcmask 1040384   ;;  %vm1320_vm5 = vcmask 1041408  }
  0x28   :  { %v1871_v9 = vpack.c.bf16 %v170_v7, %v168_v6  ;;  %v55_v10 = vld [vmem:[#allocation3 + $0x8] sm:$0xff]  ;;  %1423 = vmatprep.subr.bf16.mxu1 %v1867_v4  ;;  %v169_v14 = vld [vmem:[#allocation5 + $0x30] sm:$0xff]  ;;  %v56_v16 = vld [vmem:[#allocation3 + $0x10] sm:$0xff]  ;;  %vm1323_vm6 = vcmask 1042432   ;;  %vm1328_vm7 = vcmask 1044480   ;;  %vm1331_vm8 = vcmask 1045504  }
  0x29   :  { %v1418_v13 = vpack.c.bf16 %v57_v11, %v55_v10  ;;  %v54_v15 = vld [vmem:[#allocation3] sm:$0xff]  ;;  %1425 = vmatpush1.bf16.msra.mxu1 %v1869_v8  ;;  %v1875_v17 = vpack.c.bf16 %v169_v14, %v167_v12  ;;  %v172_v19 = vld [vmem:[#allocation5 + $0x48] sm:$0xff]  ;;  %v174_v20 = vld [vmem:[#allocation5 + $0x58] sm:$0xff]  ;;  %v64_v37 = vsub.s32 0, %v63_v36  ;;  %v68_v50 = vsub.s32 1, %v63_v36 }
  0x2a   :  { %v1420_v18 = vpack.c.bf16 %v56_v16, %v54_v15  ;;  %v59_v21 = vld [vmem:[#allocation3 + $0x28] sm:$0xf]  ;;  %1427 = vmatprep.subr.bf16.mxu1 %v1871_v9  ;;  %v1878_v22 = vpack.c.bf16 %v174_v20, %v172_v19  ;;  %v171_v23 = vld [vmem:[#allocation5 + $0x40] sm:$0xff]  ;;  %v173_v24 = vld [vmem:[#allocation5 + $0x50] sm:$0xff]  ;;  %vm1334_vm9 = vcmask 1046528  }
  0x2b   :  { %1419 = vmatprep.subr.bf16.mxu0 %v1418_v13  ;;  %v176_v25 = vld [vmem:[#allocation5 + $0x68] sm:$0xff]  ;;  %v178_v26 = vld [vmem:[#allocation5 + $0x78] sm:$0xff]  ;;  %v58_v27 = vld [vmem:[#allocation3 + $0x20] sm:$0xf]  ;;  %v1882_v28 = vpack.c.bf16 %v173_v24, %v171_v23 }
  0x2c   :  { %1421 = vmatpush1.bf16.msra.mxu0 %v1420_v18  ;;  %v52_v29 = vld [vmem:[%s2109_s0] sm:$0xff]  ;;  %v1888_v30 = vpack.c.bf16 %v178_v26, %v176_v25  ;;  %v175_v31 = vld [vmem:[#allocation5 + $0x60] sm:$0xff]  ;;  %v53_v34 = vld [vmem:[%s2109_s0 + $0x8] sm:$0xff] }
  0x2d   :  { %1374 = vmatprep.subr.msk.mxu0 %vm79_vm0, %v59_v21  ;;  %1429 = vmatpush1.bf16.msra.mxu1 %v1875_v17  ;;  %v177_v32 = vld [vmem:[#allocation5 + $0x70] sm:$0xff] }
  0x2e   :  { %1431 = vmatprep.subr.bf16.mxu1 %v1878_v22  ;;  %v1893_v33 = vpack.c.bf16 %v177_v32, %v175_v31  ;;  %v60_v38 = vld [vmem:[%s2112_s3] sm:$0x3]  ;;  %s1805_s3 = smov 64  }
  0x2f   :  { %v65_v41 = vrot.slane %v60_v38, %v64_v37  ;;  %v69_v54 = vrot.slane %v60_v38, %v68_v50 }
  0x30   :  { %1375 = vmatpush1.msk.msra.mxu0 %vm79_vm0, %v58_v27 }
  0x31   :  { %1376 = vmatmul.mubr.msk.f32.vlgmr.msra.gmra.mrb[0].mxu0 %vm72_vm1, %v52_v29  ;;  %1439 = vmatprep.subr.bf16.mxu0 %v1867_v4 }
  0x32   :  { %1433 = vmatpush1.bf16.msra.mxu1 %v1882_v28  ;;  %156 = vmatprep.mubr.f32.mxu0 %v1804_v0 }
  0x33   :  { %1435 = vmatprep.subr.bf16.mxu1 %v1888_v30  ;;  %1441 = vmatpush1.bf16.msra.mxu0 %v1869_v8 }
  0x34   :  { %1443 = vmatprep.subr.bf16.mxu0 %v1871_v9 }
  0x35   :  { %1377 = vmatmul.mubr.msk.f32.gmra.mrb[2].mxu0 %vm72_vm1, %v53_v34 }
  0x36   :  { %1437 = vmatpush1.bf16.msra.mxu1 %v1893_v33  ;;  %385 = vmatprep.mubr.f32.mxu0 %v1804_v0 }
  0x37   :  { %1445 = vmatpush1.bf16.msra.mxu0 %v1875_v17  ;;  %1455 = vmatprep.subr.bf16.mxu1 %v1867_v4 }
  0x38   :  { %1447 = vmatprep.subr.bf16.mxu0 %v1878_v22 }
  0x39   :  { %250 = vmatmul.mubr.f32.vlgmr.msra.gmra.mrb[0].mxu1 %v1804_v0 }
  0x3a   :  { %1457 = vmatpush1.bf16.msra.mxu1 %v1869_v8  ;;  %526 = vmatprep.mubr.f32.mxu1 %v1804_v0 }
  0x3b   :  { %1449 = vmatpush1.bf16.msra.mxu0 %v1882_v28  ;;  %1459 = vmatprep.subr.bf16.mxu1 %v1871_v9 }
  0x3c   :  { %1451 = vmatprep.subr.bf16.mxu0 %v1888_v30 }
  0x3e   :  { %1461 = vmatpush1.bf16.msra.mxu1 %v1875_v17 }
  0x3f   :  { %1453 = vmatpush1.bf16.msra.mxu0 %v1893_v33  ;;  %1463 = vmatprep.subr.bf16.mxu1 %v1878_v22 }
  0x40   :  { %1471 = vmatprep.subr.bf16.mxu0 %v1867_v4 }
  0x42   :  { %1465 = vmatpush1.bf16.msra.mxu1 %v1882_v28 }
  0x43   :  { %1467 = vmatprep.subr.bf16.mxu1 %v1888_v30 }
  0x46   :  { %1469 = vmatpush1.bf16.msra.mxu1 %v1893_v33 }
  0x47   :  { %1487 = vmatprep.subr.bf16.mxu1 %v1867_v4 }
 0x104   :  { %v152_v39 = vpop.f32.mrb[0].mxu0 }
 0x105   :  { %v154_v40 = vpop.f32.mrb[1].mxu0  ;;  %v1924_v44 = vadd.f32 %v152_v39, %v65_v41 }
 0x106   :  { %v1930_v55 = vadd.f32 %v154_v40, %v69_v54 }
 0x108   :  { %v158_v42 = vpop.f32.mrb[2].mxu0 }
 0x109   :  { %v160_v43 = vpop.f32.mrb[3].mxu0  ;;  %v1926_v45 = vadd.f32 %v158_v42, %v65_v41 }
 0x10a   :  { %v1932_v56 = vadd.f32 %v160_v43, %v69_v54 }
 0x10c   :  { %v251_v46 = vpop.f32.mrb[0].mxu1 }
 0x10d   :  { %v258_v47 = vrot.slane %v251_v46, 1  ;;  %v264_v48 = vadd.f32 %v251_v46, %v1924_v44  ;;  %v253_v49 = vpop.f32.mrb[1].mxu1 }
 0x10e   :  { %v259_v57 = vrot.slane %v253_v49, 1  ;;  %v265_v58 = vadd.f32 %v253_v49, %v1930_v55 }
 0x10f   :  { %v266_v51 = vadd.f32 %v258_v47, %v1926_v45  ;;  %v1378_v52 = vmul.f32 -1.442695, %v264_v48 }
 0x110   :  { %v267_v60 = vadd.f32 %v259_v57, %v1932_v56  ;;  %v1380_v11 = vmul.f32 -1.442695, %v265_v58 }
 0x111   :  { %1556 = vpow2.f32 %v1378_v52  ;;  %v1379_v53 = vmul.f32 -1.442695, %v266_v51 }
 0x112   :  { %v1381_v10 = vmul.f32 -1.442695, %v267_v60 }
 0x113   :  { %1558 = vpow2.f32 %v1379_v53 }
 0x114   :  { %1560 = vtanh.f32 %v265_v58 }
 0x11b   :  { %v1557_v59 = vpop.eup %1556 }
 0x11c   :  { %v274_v61 = vadd.f32 1.0, %v1557_v59 }
 0x11d   :  { %v1559_v62 = vpop.eup %1558 }
 0x11e   :  { %v275_v63 = vadd.f32 1.0, %v1559_v62  ;;  %1562 = vrcp.f32 %v274_v61  ;;  %v1561_v1 = vpop.eup %1560 }
 0x11f   :  { %1564 = vtanh.f32 %v267_v60 }
 0x120   :  { %1566 = vrcp.f32 %v275_v63 }
 0x121   :  { %1568 = vpow2.f32 %v1381_v10 }
 0x122   :  { %1570 = vpow2.f32 %v1380_v11 }
 0x128   :  { %v1563_v2 = vpop.eup %1562 }
 0x129   :  { %v1565_v3 = vpop.eup %1564  ;;  %v296_v5 = vmul.f32 %v1563_v2, %v1561_v1  ;;  %v294_v20 = vmul.f32 0.0, %v1563_v2 }
 0x12a   :  { %v1567_v6 = vpop.eup %1566 }
 0x12b   :  { %v297_v7 = vmul.f32 %v1567_v6, %v1565_v3  ;;  %v1569_v12 = vpop.eup %1568  ;;  %v295_v15 = vmul.f32 0.0, %v1567_v6 }
 0x12c   :  { %v289_v13 = vadd.f32 1.0, %v1569_v12  ;;  %v1571_v14 = vpop.eup %1570 }
 0x12d   :  { %302 = vrot.lane.b32.xlu0 %v297_v7, %s1805_s3  ;;  %v288_v19 = vadd.f32 1.0, %v1571_v14 }
 0x12e   :  { %1572 = vrcp.f32 %v289_v13 }
 0x131   :  { %300 = vrot.lane.b32.xlu0 %v296_v5, %s1805_s3 }
 0x138   :  { %v1573_v24 = vpop.eup %1572 }
 0x19f   :  { %v303_v16 = vpop.permute.xlu0 %302 }
 0x1a0   :  { %v307_v18 = vadd.f32 %v303_v16, %v295_v15 }
 0x1a2   :  { %1574 = vtanh.f32 %v307_v18  ;;  %v433_v53 = vrot.slane %v307_v18, 7 }
 0x1a3   :  { %v301_v21 = vpop.permute.xlu0 %300  ;;  %1576 = vrcp.f32 %v288_v19 }
 0x1a4   :  { %v306_v23 = vadd.f32 %v301_v21, %v294_v20 }
 0x1a6   :  { %1578 = vtanh.f32 %v306_v23  ;;  %v432_v58 = vrot.slane %v306_v23, 7 }
 0x1ac   :  { %v1575_v25 = vpop.eup %1574 }
 0x1ad   :  { %v1938_v26 = vmul.f32 %v1575_v25, %v1573_v24  ;;  %v1577_v27 = vpop.eup %1576 }
 0x1af   :  { %v314_v32 = vrot.slane %v1938_v26, 7 }
 0x1b0   :  { %v1579_v29 = vpop.eup %1578 }
 0x1b1   :  { %v1940_v31 = vmul.f32 %v1579_v29, %v1577_v27 }
 0x1b3   :  { %v316_v34 = vsel %vm315_vm2, %v314_v32, %v1940_v31 }
 0x1b4   :  { %317 = vrot.lane.b32.xlu1 %v316_v34, %s1805_s3 }
 0x226   :  { %v318_v35 = vpop.permute.xlu1 %317 }
 0x227   :  { %1382 = vmatmul.mubr.msk.f32.vlgmr.msra.gmra.mrb[4].mxu0 %vm181_vm3, %v318_v35 }
 0x228   :  { %1473 = vmatpush1.bf16.msra.mxu0 %v1869_v8  ;;  %670 = vmatprep.mubr.f32.mxu0 %v1804_v0 }
 0x229   :  { %1475 = vmatprep.subr.bf16.mxu0 %v1871_v9 }
 0x22c   :  { %1477 = vmatpush1.bf16.msra.mxu0 %v1875_v17 }
 0x22d   :  { %1479 = vmatprep.subr.bf16.mxu0 %v1878_v22 }
 0x230   :  { %1481 = vmatpush1.bf16.msra.mxu0 %v1882_v28 }
 0x231   :  { %1483 = vmatprep.subr.bf16.mxu0 %v1888_v30 }
 0x234   :  { %1485 = vmatpush1.bf16.msra.mxu0 %v1893_v33 }
 0x235   :  { %1503 = vmatprep.subr.bf16.mxu0 %v1867_v4 }
 0x2fa   :  { %v387_v36 = vpop.f32.mrb[4].mxu0 }
 0x2fb   :  { %v394_v37 = vrot.slane %v387_v36, 7  ;;  %v402_v38 = vadd.f32 %v387_v36, %v1926_v45  ;;  %v389_v39 = vpop.f32.mrb[5].mxu0 }
 0x2fc   :  { %v395_v43 = vrot.slane %v389_v39, 7  ;;  %v403_v46 = vadd.f32 %v389_v39, %v1932_v56 }
 0x2fd   :  { %v400_v40 = vadd.f32 %v394_v37, %v1924_v44  ;;  %v1384_v41 = vmul.f32 -1.442695, %v402_v38 }
 0x2fe   :  { %v401_v48 = vadd.f32 %v395_v43, %v1930_v55  ;;  %v1386_v1 = vmul.f32 -1.442695, %v403_v46 }
 0x2ff   :  { %v1383_v42 = vmul.f32 -1.442695, %v400_v40  ;;  %1580 = vpow2.f32 %v1384_v41 }
 0x300   :  { %v1385_v2 = vmul.f32 -1.442695, %v401_v48 }
 0x301   :  { %1582 = vpow2.f32 %v1383_v42 }
 0x302   :  { %1584 = vtanh.f32 %v403_v46 }
 0x309   :  { %v1581_v47 = vpop.eup %1580 }
 0x30a   :  { %v411_v49 = vadd.f32 1.0, %v1581_v47 }
 0x30b   :  { %v1583_v50 = vpop.eup %1582 }
 0x30c   :  { %v410_v51 = vadd.f32 1.0, %v1583_v50  ;;  %1586 = vrcp.f32 %v411_v49  ;;  %v1585_v52 = vpop.eup %1584 }
 0x30d   :  { %1588 = vtanh.f32 %v401_v48 }
 0x30e   :  { %1590 = vrcp.f32 %v410_v51 }
 0x30f   :  { %1592 = vpow2.f32 %v1386_v1 }
 0x310   :  { %1594 = vpow2.f32 %v1385_v2 }
 0x316   :  { %v1587_v54 = vpop.eup %1586 }
 0x317   :  { %v1589_v57 = vpop.eup %1588  ;;  %v439_v59 = vmul.f32 %v1587_v54, %v1585_v52  ;;  %v437_v60 = vmul.f32 %v1587_v54, %v433_v53 }
 0x318   :  { %v1591_v61 = vpop.eup %1590 }
 0x319   :  { %444 = vrot.lane.b32.xlu0 %v439_v59, %s1805_s3  ;;  %v438_v62 = vmul.f32 %v1591_v61, %v1589_v57  ;;  %v436_v63 = vmul.f32 %v1591_v61, %v432_v58  ;;  %v1593_v3 = vpop.eup %1592 }
 0x31a   :  { %v1595_v5 = vpop.eup %1594  ;;  %v425_v6 = vadd.f32 1.0, %v1593_v3 }
 0x31b   :  { %442 = vrot.lane.b32.xlu1 %v438_v62, %s1805_s3  ;;  %v424_v7 = vadd.f32 1.0, %v1595_v5 }
 0x31c   :  { %1596 = vrcp.f32 %v425_v6 }
 0x326   :  { %v1597_v14 = vpop.eup %1596 }
 0x38b   :  { %v445_v10 = vpop.permute.xlu0 %444 }
 0x38c   :  { %v449_v11 = vadd.f32 %v445_v10, %v437_v60 }
 0x38d   :  { %v443_v12 = vpop.permute.xlu1 %442 }
 0x38e   :  { %1598 = vtanh.f32 %v449_v11  ;;  %v448_v13 = vadd.f32 %v443_v12, %v436_v63  ;;  %v576_v52 = vrot.slane %v449_v11, 7 }
 0x38f   :  { %1600 = vrcp.f32 %v424_v7 }
 0x390   :  { %1602 = vtanh.f32 %v448_v13  ;;  %v575_v50 = vrot.slane %v448_v13, 7 }
 0x398   :  { %v1599_v15 = vpop.eup %1598 }
 0x399   :  { %v1601_v16 = vpop.eup %1600  ;;  %v1962_v18 = vmul.f32 %v1599_v15, %v1597_v14 }
 0x39a   :  { %v1603_v19 = vpop.eup %1602 }
 0x39b   :  { %v1964_v20 = vmul.f32 %v1603_v19, %v1601_v16  ;;  %v1319_v19 = vsel %vm1317_vm4, %v1938_v26, %v1962_v18 }
 0x39d   :  { %v456_v21 = vrot.slane %v1964_v20, 1  ;;  %v1318_v15 = vsel %vm1317_vm4, %v1940_v31, %v1964_v20 }
 0x39f   :  { %v457_v23 = vsel %vm315_vm2, %v1962_v18, %v456_v21 }
 0x3a0   :  { %458 = vrot.lane.b32.xlu1 %v457_v23, %s1805_s3 }
 0x412   :  { %v459_v24 = vpop.permute.xlu1 %458 }
 0x413   :  { %1387 = vmatmul.mubr.msk.f32.vlgmr.msra.gmra.mrb[2].mxu1 %vm181_vm3, %v459_v24 }
 0x414   :  { %1489 = vmatpush1.bf16.msra.mxu1 %v1869_v8  ;;  %814 = vmatprep.mubr.f32.mxu1 %v1804_v0 }
 0x415   :  { %1491 = vmatprep.subr.bf16.mxu1 %v1871_v9 }
 0x418   :  { %1493 = vmatpush1.bf16.msra.mxu1 %v1875_v17 }
 0x419   :  { %1495 = vmatprep.subr.bf16.mxu1 %v1878_v22 }
 0x41c   :  { %1497 = vmatpush1.bf16.msra.mxu1 %v1882_v28 }
 0x41d   :  { %1499 = vmatprep.subr.bf16.mxu1 %v1888_v30 }
 0x420   :  { %1501 = vmatpush1.bf16.msra.mxu1 %v1893_v33 }
 0x421   :  { %1519 = vmatprep.subr.bf16.mxu1 %v1867_v4 }
 0x4e6   :  { %v528_v25 = vpop.f32.mrb[2].mxu1 }
 0x4e7   :  { %v535_v27 = vrot.slane %v528_v25, 6  ;;  %v537_v29 = vrot.slane %v528_v25, 7  ;;  %v530_v32 = vpop.f32.mrb[3].mxu1 }
 0x4e8   :  { %v536_v38 = vrot.slane %v530_v32, 6  ;;  %v538_v39 = vrot.slane %v530_v32, 7 }
 0x4e9   :  { %v543_v34 = vadd.f32 %v535_v27, %v1924_v44  ;;  %v545_v35 = vadd.f32 %v537_v29, %v1926_v45 }
 0x4ea   :  { %v544_v40 = vadd.f32 %v536_v38, %v1930_v55  ;;  %v546_v41 = vadd.f32 %v538_v39, %v1932_v56 }
 0x4eb   :  { %v1388_v36 = vmul.f32 -1.442695, %v543_v34  ;;  %v1389_v37 = vmul.f32 -1.442695, %v545_v35 }
 0x4ec   :  { %v1390_v60 = vmul.f32 -1.442695, %v544_v40  ;;  %v1391_v61 = vmul.f32 -1.442695, %v546_v41 }
 0x4ed   :  { %1604 = vpow2.f32 %v1388_v36 }
 0x4ee   :  { %1606 = vpow2.f32 %v1389_v37 }
 0x4ef   :  { %1608 = vtanh.f32 %v544_v40 }
 0x4f0   :  { %1610 = vtanh.f32 %v546_v41 }
 0x4f7   :  { %v1605_v42 = vpop.eup %1604 }
 0x4f8   :  { %v1607_v43 = vpop.eup %1606  ;;  %v553_v46 = vadd.f32 1.0, %v1605_v42 }
 0x4f9   :  { %v554_v47 = vadd.f32 1.0, %v1607_v43  ;;  %v1609_v48 = vpop.eup %1608 }
 0x4fa   :  { %1612 = vrcp.f32 %v553_v46  ;;  %v1611_v49 = vpop.eup %1610 }
 0x4fb   :  { %1614 = vrcp.f32 %v554_v47 }
 0x4fc   :  { %1616 = vpow2.f32 %v1390_v60 }
 0x4fd   :  { %1618 = vpow2.f32 %v1391_v61 }
 0x504   :  { %v1613_v51 = vpop.eup %1612 }
 0x505   :  { %v1615_v53 = vpop.eup %1614  ;;  %v581_v54 = vmul.f32 %v1613_v51, %v1609_v48  ;;  %v579_v57 = vmul.f32 %v1613_v51, %v575_v50 }
 0x506   :  { %v582_v58 = vmul.f32 %v1615_v53, %v1611_v49  ;;  %v580_v59 = vmul.f32 %v1615_v53, %v576_v52  ;;  %v1617_v62 = vpop.eup %1616 }
 0x507   :  { %585 = vrot.lane.b32.xlu0 %v581_v54, %s1805_s3  ;;  %v1619_v63 = vpop.eup %1618  ;;  %v567_v1 = vadd.f32 1.0, %v1617_v62 }
 0x508   :  { %587 = vrot.lane.b32.xlu1 %v582_v58, %s1805_s3  ;;  %v568_v2 = vadd.f32 1.0, %v1619_v63 }
 0x509   :  { %1620 = vrcp.f32 %v567_v1 }
 0x50a   :  { %1622 = vrcp.f32 %v568_v2 }
 0x513   :  { %v1621_v10 = vpop.eup %1620 }
 0x514   :  { %v1623_v11 = vpop.eup %1622 }
 0x579   :  { %v586_v3 = vpop.permute.xlu0 %585 }
 0x57a   :  { %v588_v5 = vpop.permute.xlu1 %587  ;;  %v591_v6 = vadd.f32 %v586_v3, %v579_v57 }
 0x57b   :  { %v592_v7 = vadd.f32 %v588_v5, %v580_v59 }
 0x57c   :  { %1624 = vtanh.f32 %v591_v6  ;;  %v719_v48 = vrot.slane %v591_v6, 7 }
 0x57d   :  { %1626 = vtanh.f32 %v592_v7  ;;  %v720_v50 = vrot.slane %v592_v7, 7 }
 0x586   :  { %v1625_v12 = vpop.eup %1624 }
 0x587   :  { %v1627_v13 = vpop.eup %1626  ;;  %v595_v14 = vmul.f32 %v1625_v12, %v1621_v10 }
 0x588   :  { %v596_v16 = vmul.f32 %v1627_v13, %v1623_v11 }
 0x589   :  { %v599_v21 = vrot.slane %v595_v14, 2  ;;  %v1990_v23 = vsel %vm1320_vm5, %v1318_v15, %v595_v14 }
 0x58a   :  { %v600_v24 = vrot.slane %v596_v16, 1  ;;  %v1992_v25 = vsel %vm1320_vm5, %v1319_v19, %v596_v16 }
 0x58c   :  { %v601_v27 = vsel %vm315_vm2, %v600_v24, %v599_v21 }
 0x58d   :  { %602 = vrot.lane.b32.xlu0 %v601_v27, %s1805_s3 }
 0x5ff   :  { %v603_v29 = vpop.permute.xlu0 %602 }
 0x600   :  { %1392 = vmatmul.mubr.msk.f32.vlgmr.msra.gmra.mrb[6].mxu0 %vm181_vm3, %v603_v29 }
 0x601   :  { %1505 = vmatpush1.bf16.msra.mxu0 %v1869_v8  ;;  %958 = vmatprep.mubr.f32.mxu0 %v1804_v0 }
 0x602   :  { %1507 = vmatprep.subr.bf16.mxu0 %v1871_v9 }
 0x605   :  { %1509 = vmatpush1.bf16.msra.mxu0 %v1875_v17 }
 0x606   :  { %1511 = vmatprep.subr.bf16.mxu0 %v1878_v22 }
 0x609   :  { %1513 = vmatpush1.bf16.msra.mxu0 %v1882_v28 }
 0x60a   :  { %1515 = vmatprep.subr.bf16.mxu0 %v1888_v30 }
 0x60d   :  { %1517 = vmatpush1.bf16.msra.mxu0 %v1893_v33 }
 0x60e   :  { %1535 = vmatprep.subr.bf16.mxu0 %v1867_v4 }
 0x6d3   :  { %v672_v26 = vpop.f32.mrb[6].mxu0 }
 0x6d4   :  { %v679_v31 = vrot.slane %v672_v26, 5  ;;  %v681_v18 = vrot.slane %v672_v26, 6  ;;  %v674_v20 = vpop.f32.mrb[7].mxu0 }
 0x6d5   :  { %v680_v37 = vrot.slane %v674_v20, 5  ;;  %v682_v38 = vrot.slane %v674_v20, 6 }
 0x6d6   :  { %v687_v32 = vadd.f32 %v679_v31, %v1924_v44  ;;  %v689_v34 = vadd.f32 %v681_v18, %v1926_v45 }
 0x6d7   :  { %v688_v39 = vadd.f32 %v680_v37, %v1930_v55  ;;  %v690_v40 = vadd.f32 %v682_v38, %v1932_v56 }
 0x6d8   :  { %v1393_v35 = vmul.f32 -1.442695, %v687_v32  ;;  %v1394_v36 = vmul.f32 -1.442695, %v689_v34 }
 0x6d9   :  { %v1395_v58 = vmul.f32 -1.442695, %v688_v39  ;;  %v1396_v59 = vmul.f32 -1.442695, %v690_v40 }
 0x6da   :  { %1628 = vpow2.f32 %v1393_v35 }
 0x6db   :  { %1630 = vpow2.f32 %v1394_v36 }
 0x6dc   :  { %1632 = vtanh.f32 %v688_v39 }
 0x6dd   :  { %1634 = vtanh.f32 %v690_v40 }
 0x6e4   :  { %v1629_v41 = vpop.eup %1628 }
 0x6e5   :  { %v1631_v4 = vpop.eup %1630  ;;  %v697_v42 = vadd.f32 1.0, %v1629_v41 }
 0x6e6   :  { %v698_v43 = vadd.f32 1.0, %v1631_v4  ;;  %v1633_v46 = vpop.eup %1632 }
 0x6e7   :  { %1636 = vrcp.f32 %v697_v42  ;;  %v1635_v47 = vpop.eup %1634 }
 0x6e8   :  { %1638 = vrcp.f32 %v698_v43 }
 0x6e9   :  { %1640 = vpow2.f32 %v1395_v58 }
 0x6ea   :  { %1642 = vpow2.f32 %v1396_v59 }
 0x6f1   :  { %v1637_v49 = vpop.eup %1636 }
 0x6f2   :  { %v1639_v51 = vpop.eup %1638  ;;  %v725_v52 = vmul.f32 %v1637_v49, %v1633_v46  ;;  %v723_v53 = vmul.f32 %v1637_v49, %v719_v48 }
 0x6f3   :  { %v726_v54 = vmul.f32 %v1639_v51, %v1635_v47  ;;  %v724_v57 = vmul.f32 %v1639_v51, %v720_v50  ;;  %v1641_v60 = vpop.eup %1640 }
 0x6f4   :  { %729 = vrot.lane.b32.xlu1 %v725_v52, %s1805_s3  ;;  %v1643_v61 = vpop.eup %1642  ;;  %v711_v62 = vadd.f32 1.0, %v1641_v60 }
 0x6f5   :  { %731 = vrot.lane.b32.xlu0 %v726_v54, %s1805_s3  ;;  %v712_v63 = vadd.f32 1.0, %v1643_v61 }
 0x6f6   :  { %1644 = vrcp.f32 %v711_v62 }
 0x6f7   :  { %1646 = vrcp.f32 %v712_v63 }
 0x700   :  { %v1645_v6 = vpop.eup %1644 }
 0x701   :  { %v1647_v7 = vpop.eup %1646 }
 0x766   :  { %v730_v1 = vpop.permute.xlu1 %729 }
 0x767   :  { %v732_v2 = vpop.permute.xlu0 %731  ;;  %v735_v3 = vadd.f32 %v730_v1, %v723_v53 }
 0x768   :  { %v736_v5 = vadd.f32 %v732_v2, %v724_v57 }
 0x769   :  { %1648 = vtanh.f32 %v735_v3  ;;  %v863_v42 = vrot.slane %v735_v3, 7 }
 0x76a   :  { %1650 = vtanh.f32 %v736_v5  ;;  %v864_v46 = vrot.slane %v736_v5, 7 }
 0x773   :  { %v1649_v10 = vpop.eup %1648 }
 0x774   :  { %v1651_v11 = vpop.eup %1650  ;;  %v739_v12 = vmul.f32 %v1649_v10, %v1645_v6 }
 0x775   :  { %v740_v13 = vmul.f32 %v1651_v11, %v1647_v7 }
 0x776   :  { %v743_v14 = vrot.slane %v739_v12, 3  ;;  %v2013_v15 = vsel %vm1323_vm6, %v1990_v23, %v739_v12 }
 0x777   :  { %v744_v16 = vrot.slane %v740_v13, 2  ;;  %v2016_v19 = vsel %vm1323_vm6, %v1992_v25, %v740_v13 }
 0x779   :  { %v745_v21 = vsel %vm315_vm2, %v744_v16, %v743_v14 }
 0x77a   :  { %746 = vrot.lane.b32.xlu1 %v745_v21, %s1805_s3 }
 0x7ec   :  { %v747_v24 = vpop.permute.xlu1 %746 }
 0x7ed   :  { %1397 = vmatmul.mubr.msk.f32.vlgmr.msra.gmra.mrb[4].mxu1 %vm181_vm3, %v747_v24 }
 0x7ee   :  { %1521 = vmatpush1.bf16.msra.mxu1 %v1869_v8  ;;  %1102 = vmatprep.mubr.f32.mxu1 %v1804_v0 }
 0x7ef   :  { %1523 = vmatprep.subr.bf16.mxu1 %v1871_v9 }
 0x7f2   :  { %1525 = vmatpush1.bf16.msra.mxu1 %v1875_v17 }
 0x7f3   :  { %1527 = vmatprep.subr.bf16.mxu1 %v1878_v22 }
 0x7f6   :  { %1529 = vmatpush1.bf16.msra.mxu1 %v1882_v28 }
 0x7f7   :  { %1531 = vmatprep.subr.bf16.mxu1 %v1888_v30 }
 0x7fa   :  { %1533 = vmatpush1.bf16.msra.mxu1 %v1893_v33 }
 0x8c0   :  { %v816_v23 = vpop.f32.mrb[4].mxu1 }
 0x8c1   :  { %v823_v25 = vrot.slane %v816_v23, 4  ;;  %v825_v27 = vrot.slane %v816_v23, 5  ;;  %v818_v29 = vpop.f32.mrb[5].mxu1 }
 0x8c2   :  { %v824_v32 = vrot.slane %v818_v29, 4  ;;  %v826_v34 = vrot.slane %v818_v29, 5 }
 0x8c3   :  { %v831_v26 = vadd.f32 %v823_v25, %v1924_v44  ;;  %v833_v31 = vadd.f32 %v825_v27, %v1926_v45 }
 0x8c4   :  { %v832_v35 = vadd.f32 %v824_v32, %v1930_v55  ;;  %v834_v36 = vadd.f32 %v826_v34, %v1932_v56 }
 0x8c5   :  { %v1398_v18 = vmul.f32 -1.442695, %v831_v26  ;;  %v1399_v20 = vmul.f32 -1.442695, %v833_v31 }
 0x8c6   :  { %v1400_v52 = vmul.f32 -1.442695, %v832_v35  ;;  %v1401_v53 = vmul.f32 -1.442695, %v834_v36 }
 0x8c7   :  { %1652 = vpow2.f32 %v1398_v18 }
 0x8c8   :  { %1654 = vpow2.f32 %v1399_v20 }
 0x8c9   :  { %1656 = vtanh.f32 %v832_v35 }
 0x8ca   :  { %1658 = vtanh.f32 %v834_v36 }
 0x8d1   :  { %v1653_v37 = vpop.eup %1652 }
 0x8d2   :  { %v1655_v38 = vpop.eup %1654  ;;  %v841_v39 = vadd.f32 1.0, %v1653_v37 }
 0x8d3   :  { %v842_v40 = vadd.f32 1.0, %v1655_v38  ;;  %v1657_v41 = vpop.eup %1656 }
 0x8d4   :  { %1660 = vrcp.f32 %v841_v39  ;;  %v1659_v4 = vpop.eup %1658 }
 0x8d5   :  { %1662 = vrcp.f32 %v842_v40 }
 0x8d6   :  { %1664 = vpow2.f32 %v1400_v52 }
 0x8d7   :  { %1666 = vpow2.f32 %v1401_v53 }
 0x8de   :  { %v1661_v43 = vpop.eup %1660 }
 0x8df   :  { %v1663_v47 = vpop.eup %1662  ;;  %v869_v48 = vmul.f32 %v1661_v43, %v1657_v41  ;;  %v867_v49 = vmul.f32 %v1661_v43, %v863_v42 }
 0x8e0   :  { %v870_v50 = vmul.f32 %v1663_v47, %v1659_v4  ;;  %v868_v51 = vmul.f32 %v1663_v47, %v864_v46  ;;  %v1665_v54 = vpop.eup %1664 }
 0x8e1   :  { %873 = vrot.lane.b32.xlu0 %v869_v48, %s1805_s3  ;;  %v1667_v57 = vpop.eup %1666  ;;  %v855_v58 = vadd.f32 1.0, %v1665_v54 }
 0x8e2   :  { %875 = vrot.lane.b32.xlu1 %v870_v50, %s1805_s3  ;;  %v856_v59 = vadd.f32 1.0, %v1667_v57 }
 0x8e3   :  { %1668 = vrcp.f32 %v855_v58 }
 0x8e4   :  { %1670 = vrcp.f32 %v856_v59 }
 0x8ed   :  { %v1669_v1 = vpop.eup %1668 }
 0x8ee   :  { %v1671_v2 = vpop.eup %1670 }
 0x953   :  { %v874_v60 = vpop.permute.xlu0 %873 }
 0x954   :  { %v876_v61 = vpop.permute.xlu1 %875  ;;  %v879_v62 = vadd.f32 %v874_v60, %v867_v49 }
 0x955   :  { %v880_v63 = vadd.f32 %v876_v61, %v868_v51 }
 0x956   :  { %1672 = vtanh.f32 %v879_v62  ;;  %v1007_v18 = vrot.slane %v879_v62, 7 }
 0x957   :  { %1674 = vtanh.f32 %v880_v63  ;;  %v1008_v32 = vrot.slane %v880_v63, 7 }
 0x960   :  { %v1673_v3 = vpop.eup %1672 }
 0x961   :  { %v1675_v5 = vpop.eup %1674  ;;  %v883_v6 = vmul.f32 %v1673_v3, %v1669_v1 }
 0x962   :  { %v884_v7 = vmul.f32 %v1675_v5, %v1671_v2 }
 0x963   :  { %v887_v10 = vrot.slane %v883_v6, 4  ;;  %v2037_v11 = vsel %vm79_vm0, %v2013_v15, %v883_v6 }
 0x964   :  { %v888_v12 = vrot.slane %v884_v7, 3  ;;  %v2041_v13 = vsel %vm79_vm0, %v2016_v19, %v884_v7 }
 0x966   :  { %v889_v14 = vsel %vm315_vm2, %v888_v12, %v887_v10 }
 0x967   :  { %890 = vrot.lane.b32.xlu0 %v889_v14, %s1805_s3 }
 0x9d9   :  { %v891_v16 = vpop.permute.xlu0 %890 }
 0x9da   :  { %1402 = vmatmul.mubr.msk.f32.vlgmr.msra.gmra.mrb[8].mxu0 %vm181_vm3, %v891_v16 }
 0x9db   :  { %1537 = vmatpush1.bf16.msra.mxu0 %v1869_v8  ;;  %1246 = vmatprep.mubr.f32.mxu0 %v1804_v0 }
 0x9dc   :  { %1539 = vmatprep.subr.bf16.mxu0 %v1871_v9 }
 0x9df   :  { %1541 = vmatpush1.bf16.msra.mxu0 %v1875_v17 }
 0x9e0   :  { %1543 = vmatprep.subr.bf16.mxu0 %v1878_v22 }
 0x9e3   :  { %1545 = vmatpush1.bf16.msra.mxu0 %v1882_v28 }
 0x9e4   :  { %1547 = vmatprep.subr.bf16.mxu0 %v1888_v30 }
 0x9e7   :  { %1549 = vmatpush1.bf16.msra.mxu0 %v1893_v33 }
 0xaad   :  { %v960_v15 = vpop.f32.mrb[8].mxu0 }
 0xaae   :  { %v967_v19 = vrot.slane %v960_v15, 3  ;;  %v969_v21 = vrot.slane %v960_v15, 4  ;;  %v962_v24 = vpop.f32.mrb[9].mxu0 }
 0xaaf   :  { %v968_v17 = vrot.slane %v962_v24, 3  ;;  %v970_v22 = vrot.slane %v962_v24, 4 }
 0xab0   :  { %v975_v8 = vadd.f32 %v967_v19, %v1924_v44  ;;  %v977_v0 = vadd.f32 %v969_v21, %v1926_v45 }
 0xab1   :  { %v976_v28 = vadd.f32 %v968_v17, %v1930_v55  ;;  %v978_v30 = vadd.f32 %v970_v22, %v1932_v56 }
 0xab2   :  { %v1403_v23 = vmul.f32 -1.442695, %v975_v8  ;;  %v1404_v9 = vmul.f32 -1.442695, %v977_v0 }
 0xab3   :  { %v1405_v39 = vmul.f32 -1.442695, %v976_v28  ;;  %v1406_v40 = vmul.f32 -1.442695, %v978_v30 }
 0xab4   :  { %1676 = vpow2.f32 %v1403_v23 }
 0xab5   :  { %1678 = vpow2.f32 %v1404_v9 }
 0xab6   :  { %1680 = vtanh.f32 %v976_v28 }
 0xab7   :  { %1682 = vtanh.f32 %v978_v30 }
 0xabe   :  { %v1677_v25 = vpop.eup %1676 }
 0xabf   :  { %v1679_v33 = vpop.eup %1678  ;;  %v985_v27 = vadd.f32 1.0, %v1677_v25 }
 0xac0   :  { %v986_v29 = vadd.f32 1.0, %v1679_v33  ;;  %v1681_v26 = vpop.eup %1680 }
 0xac1   :  { %1684 = vrcp.f32 %v985_v27  ;;  %v1683_v31 = vpop.eup %1682 }
 0xac2   :  { %1686 = vrcp.f32 %v986_v29 }
 0xac3   :  { %1688 = vpow2.f32 %v1405_v39 }
 0xac4   :  { %1690 = vpow2.f32 %v1406_v40 }
 0xacb   :  { %v1685_v20 = vpop.eup %1684 }
 0xacc   :  { %v1687_v34 = vpop.eup %1686  ;;  %v1013_v35 = vmul.f32 %v1685_v20, %v1681_v26  ;;  %v1011_v36 = vmul.f32 %v1685_v20, %v1007_v18 }
 0xacd   :  { %v1014_v37 = vmul.f32 %v1687_v34, %v1683_v31  ;;  %v1012_v38 = vmul.f32 %v1687_v34, %v1008_v32  ;;  %v1689_v41 = vpop.eup %1688 }
 0xace   :  { %1017 = vrot.lane.b32.xlu1 %v1013_v35, %s1805_s3  ;;  %v1691_v4 = vpop.eup %1690  ;;  %v999_v42 = vadd.f32 1.0, %v1689_v41 }
 0xacf   :  { %1019 = vrot.lane.b32.xlu0 %v1014_v37, %s1805_s3  ;;  %v1000_v43 = vadd.f32 1.0, %v1691_v4 }
 0xad0   :  { %1692 = vrcp.f32 %v999_v42 }
 0xad1   :  { %1694 = vrcp.f32 %v1000_v43 }
 0xada   :  { %v1693_v50 = vpop.eup %1692 }
 0xadb   :  { %v1695_v51 = vpop.eup %1694 }
 0xb40   :  { %v1018_v46 = vpop.permute.xlu1 %1017 }
 0xb41   :  { %v1020_v47 = vpop.permute.xlu0 %1019  ;;  %v1023_v48 = vadd.f32 %v1018_v46, %v1011_v36 }
 0xb42   :  { %v1024_v49 = vadd.f32 %v1020_v47, %v1012_v38 }
 0xb43   :  { %1696 = vtanh.f32 %v1023_v48  ;;  %v1151_v23 = vrot.slane %v1023_v48, 7 }
 0xb44   :  { %1698 = vtanh.f32 %v1024_v49  ;;  %v1152_v17 = vrot.slane %v1024_v49, 7 }
 0xb4d   :  { %v1697_v52 = vpop.eup %1696 }
 0xb4e   :  { %v1699_v53 = vpop.eup %1698  ;;  %v1027_v54 = vmul.f32 %v1697_v52, %v1693_v50 }
 0xb4f   :  { %v1028_v57 = vmul.f32 %v1699_v53, %v1695_v51 }
 0xb50   :  { %v1031_v58 = vrot.slane %v1027_v54, 5  ;;  %v2061_v59 = vsel %vm1328_vm7, %v2037_v11, %v1027_v54 }
 0xb51   :  { %v1032_v60 = vrot.slane %v1028_v57, 4  ;;  %v2064_v61 = vsel %vm1328_vm7, %v2041_v13, %v1028_v57 }
 0xb53   :  { %v1033_v62 = vsel %vm315_vm2, %v1032_v60, %v1031_v58 }
 0xb54   :  { %1034 = vrot.lane.b32.xlu1 %v1033_v62, %s1805_s3 }
 0xbc6   :  { %v1035_v63 = vpop.permute.xlu1 %1034 }
 0xbc7   :  { %1407 = vmatmul.mubr.msk.f32.vlgmr.msra.gmra.mrb[6].mxu1 %vm181_vm3, %v1035_v63 }
 0xc9a   :  { %v1104_v1 = vpop.f32.mrb[6].mxu1 }
 0xc9b   :  { %v1111_v2 = vrot.slane %v1104_v1, 2  ;;  %v1113_v3 = vrot.slane %v1104_v1, 3  ;;  %v1106_v5 = vpop.f32.mrb[7].mxu1 }
 0xc9c   :  { %v1112_v12 = vrot.slane %v1106_v5, 2  ;;  %v1114_v13 = vrot.slane %v1106_v5, 3 }
 0xc9d   :  { %v1119_v6 = vadd.f32 %v1111_v2, %v1924_v44  ;;  %v1121_v7 = vadd.f32 %v1113_v3, %v1926_v45 }
 0xc9e   :  { %v1120_v14 = vadd.f32 %v1112_v12, %v1930_v55  ;;  %v1122_v16 = vadd.f32 %v1114_v13, %v1932_v56 }
 0xc9f   :  { %v1408_v10 = vmul.f32 -1.442695, %v1119_v6  ;;  %v1409_v11 = vmul.f32 -1.442695, %v1121_v7 }
 0xca0   :  { %v1410_v27 = vmul.f32 -1.442695, %v1120_v14  ;;  %v1411_v29 = vmul.f32 -1.442695, %v1122_v16 }
 0xca1   :  { %1700 = vpow2.f32 %v1408_v10 }
 0xca2   :  { %1702 = vpow2.f32 %v1409_v11 }
 0xca3   :  { %1704 = vtanh.f32 %v1120_v14 }
 0xca4   :  { %1706 = vtanh.f32 %v1122_v16 }
 0xcab   :  { %v1701_v15 = vpop.eup %1700 }
 0xcac   :  { %v1703_v19 = vpop.eup %1702  ;;  %v1129_v21 = vadd.f32 1.0, %v1701_v15 }
 0xcad   :  { %v1130_v24 = vadd.f32 1.0, %v1703_v19  ;;  %v1705_v8 = vpop.eup %1704 }
 0xcae   :  { %1708 = vrcp.f32 %v1129_v21  ;;  %v1707_v0 = vpop.eup %1706 }
 0xcaf   :  { %1710 = vrcp.f32 %v1130_v24 }
 0xcb0   :  { %1712 = vpow2.f32 %v1410_v27 }
 0xcb1   :  { %1714 = vpow2.f32 %v1411_v29 }
 0xcb8   :  { %v1709_v9 = vpop.eup %1708 }
 0xcb9   :  { %v1711_v22 = vpop.eup %1710  ;;  %v1157_v28 = vmul.f32 %v1709_v9, %v1705_v8  ;;  %v1155_v30 = vmul.f32 %v1709_v9, %v1151_v23 }
 0xcba   :  { %v1158_v25 = vmul.f32 %v1711_v22, %v1707_v0  ;;  %v1156_v33 = vmul.f32 %v1711_v22, %v1152_v17  ;;  %v1713_v26 = vpop.eup %1712 }
 0xcbb   :  { %1161 = vrot.lane.b32.xlu0 %v1157_v28, %s1805_s3  ;;  %v1715_v31 = vpop.eup %1714  ;;  %v1143_v18 = vadd.f32 1.0, %v1713_v26 }
 0xcbc   :  { %1163 = vrot.lane.b32.xlu1 %v1158_v25, %s1805_s3  ;;  %v1144_v20 = vadd.f32 1.0, %v1715_v31 }
 0xcbd   :  { %1716 = vrcp.f32 %v1143_v18 }
 0xcbe   :  { %1718 = vrcp.f32 %v1144_v20 }
 0xcc7   :  { %v1717_v37 = vpop.eup %1716 }
 0xcc8   :  { %v1719_v38 = vpop.eup %1718 }
 0xd2d   :  { %v1162_v32 = vpop.permute.xlu0 %1161 }
 0xd2e   :  { %v1164_v34 = vpop.permute.xlu1 %1163  ;;  %v1167_v35 = vadd.f32 %v1162_v32, %v1155_v30 }
 0xd2f   :  { %v1168_v36 = vadd.f32 %v1164_v34, %v1156_v33 }
 0xd30   :  { %1720 = vtanh.f32 %v1167_v35  ;;  %v1295_v6 = vrot.slane %v1167_v35, 7 }
 0xd31   :  { %1722 = vtanh.f32 %v1168_v36  ;;  %v1296_v10 = vrot.slane %v1168_v36, 7 }
 0xd3a   :  { %v1721_v39 = vpop.eup %1720 }
 0xd3b   :  { %v1723_v40 = vpop.eup %1722  ;;  %v1171_v41 = vmul.f32 %v1721_v39, %v1717_v37  ;;  %v1361_v37 = vstv %s2114_s5 }
 0xd3c   :  { %v1172_v4 = vmul.f32 %v1723_v40, %v1719_v38 }
 0xd3d   :  { %v1175_v42 = vrot.slane %v1171_v41, 6  ;;  %v2076_v43 = vsel %vm1331_vm8, %v2061_v59, %v1171_v41 }
 0xd3e   :  { %v1176_v46 = vrot.slane %v1172_v4, 5  ;;  %v2079_v47 = vsel %vm1331_vm8, %v2064_v61, %v1172_v4 }
 0xd40   :  { %v1177_v48 = vsel %vm315_vm2, %v1176_v46, %v1175_v42 }
 0xd41   :  { %1178 = vrot.lane.b32.xlu0 %v1177_v48, %s1805_s3 }
 0xdb3   :  { %v1179_v49 = vpop.permute.xlu0 %1178 }
 0xdb4   :  { %1412 = vmatmul.mubr.msk.f32.vlgmr.msra.gmra.mrb[10].mxu0 %vm181_vm3, %v1179_v49 }
 0xe87   :  { %v1248_v50 = vpop.f32.mrb[10].mxu0 }
 0xe88   :  { %v1255_v51 = vrot.slane %v1248_v50, 1  ;;  %v1257_v52 = vrot.slane %v1248_v50, 2  ;;  %v1250_v53 = vpop.f32.mrb[11].mxu0 }
 0xe89   :  { %v1256_v60 = vrot.slane %v1250_v53, 1  ;;  %v1258_v61 = vrot.slane %v1250_v53, 2 }
 0xe8a   :  { %v1263_v54 = vadd.f32 %v1255_v51, %v1924_v44  ;;  %v1265_v57 = vadd.f32 %v1257_v52, %v1926_v45 }
 0xe8b   :  { %v1264_v62 = vadd.f32 %v1256_v60, %v1930_v55  ;;  %v1266_v63 = vadd.f32 %v1258_v61, %v1932_v56  ;;  %v1417_v56 = vld [vmem:[%s2113_s4] ss:$0 sm:$0xff] }
 0xe8c   :  { %v1413_v58 = vmul.f32 -1.442695, %v1263_v54  ;;  %v1414_v59 = vmul.f32 -1.442695, %v1265_v57 }
 0xe8d   :  { %v1415_v16 = vmul.f32 -1.442695, %v1264_v62  ;;  %v1416_v15 = vmul.f32 -1.442695, %v1266_v63 }
 0xe8e   :  { %1724 = vpow2.f32 %v1413_v58 }
 0xe8f   :  { %1726 = vpow2.f32 %v1414_v59 }
 0xe90   :  { %1728 = vtanh.f32 %v1264_v62 }
 0xe91   :  { %1730 = vtanh.f32 %v1266_v63 }
 0xe98   :  { %v1725_v1 = vpop.eup %1724 }
 0xe99   :  { %v1727_v2 = vpop.eup %1726  ;;  %v1273_v3 = vadd.f32 1.0, %v1725_v1 }
 0xe9a   :  { %v1274_v5 = vadd.f32 1.0, %v1727_v2  ;;  %v1729_v44 = vpop.eup %1728 }
 0xe9b   :  { %1732 = vrcp.f32 %v1273_v3  ;;  %v1731_v45 = vpop.eup %1730 }
 0xe9c   :  { %1734 = vrcp.f32 %v1274_v5 }
 0xe9d   :  { %1736 = vpow2.f32 %v1415_v16 }
 0xe9e   :  { %1738 = vpow2.f32 %v1416_v15 }
 0xea5   :  { %v1733_v7 = vpop.eup %1732 }
 0xea6   :  { %v1735_v11 = vpop.eup %1734  ;;  %v1301_v12 = vmul.f32 %v1733_v7, %v1729_v44  ;;  %v1299_v13 = vmul.f32 %v1733_v7, %v1295_v6 }
 0xea7   :  { %v1302_v14 = vmul.f32 %v1735_v11, %v1731_v45  ;;  %v1300_v55 = vmul.f32 %v1735_v11, %v1296_v10  ;;  %v1737_v19 = vpop.eup %1736 }
 0xea8   :  { %1305 = vrot.lane.b32.xlu1 %v1301_v12, %s1805_s3  ;;  %v1739_v21 = vpop.eup %1738  ;;  %v1287_v24 = vadd.f32 1.0, %v1737_v19 }
 0xea9   :  { %1307 = vrot.lane.b32.xlu0 %v1302_v14, %s1805_s3  ;;  %v1288_v8 = vadd.f32 1.0, %v1739_v21 }
 0xeaa   :  { %1740 = vrcp.f32 %v1287_v24 }
 0xeab   :  { %1742 = vrcp.f32 %v1288_v8 }
 0xeac   :  { %1342 = vrot.lane.b32.xlu1 %v1417_v56, %s1805_s3 }
 0xeb4   :  { %v1741_v22 = vpop.eup %1740 }
 0xeb5   :  { %v1743_v28 = vpop.eup %1742 }
 0xf1a   :  { %v1306_v0 = vpop.permute.xlu1 %1305 }
 0xf1b   :  { %v1308_v23 = vpop.permute.xlu0 %1307  ;;  %v1311_v9 = vadd.f32 %v1306_v0, %v1299_v13 }
 0xf1c   :  { %v1312_v17 = vadd.f32 %v1308_v23, %v1300_v55 }
 0xf1d   :  { %1744 = vtanh.f32 %v1311_v9 }
 0xf1e   :  { %1746 = vtanh.f32 %v1312_v17  ;;  %v1343_v27 = vpop.permute.xlu1 %1342 }
 0xf27   :  { %v1745_v30 = vpop.eup %1744 }
 0xf28   :  { %v1747_v25 = vpop.eup %1746  ;;  %v1315_v33 = vmul.f32 %v1745_v30, %v1741_v22 }
 0xf29   :  { %v1316_v29 = vmul.f32 %v1747_v25, %v1743_v28 }
 0xf2a   :  { %v1335_v26 = vsel %vm1334_vm9, %v2076_v43, %v1315_v33 }
 0xf2b   :  { %v1336_v31 = vsel %vm1334_vm9, %v2079_v47, %v1316_v29  ;;  %v1345_v18 = vmul.f32 %v1343_v27, %v1335_v26 }
 0xf2c   :  { %v1346_v20 = vmul.f32 %v1343_v27, %v1336_v31 }
 0xf2d   :  { %1349 = vrot.lane.b32.xlu0 %v1345_v18, %s1805_s3 }
 0xf2e   :  { %1351 = vrot.lane.b32.xlu1 %v1346_v20, %s1805_s3 }
 0xf9f   :  { %v1350_v32 = vpop.permute.xlu0 %1349 }
 0xfa0   :  { %v1352_v34 = vpop.permute.xlu1 %1351  ;;  %v1355_v35 = vsel %vm181_vm3, %v1350_v32, 0.0 }
 0xfa1   :  { %v1358_v36 = vsel %vm181_vm3, %v1352_v34, 0.0  ;;  %1356 = vadd.xlane.f32.xlu0 %v1355_v35 }
 0xfa2   :  { %1359 = vadd.xlane.f32.xlu1 %v1358_v36 }
0x102e   :  { %v1357_v38 = vpop.xlane.xlu0 %1356 }
0x102f   :  { %v1360_v39 = vpop.xlane.xlu1 %1359  ;;  %v1362_v40 = vadd.f32 %v1361_v37, %v1357_v38 }
0x1030   :  { %v1363_v41 = vadd.f32 %v1361_v37, %v1360_v39 }
0x1031   :  { %1748 = vtanh.f32 %v1362_v40 }
0x1032   :  { %1750 = vtanh.f32 %v1363_v41 }
0x103b   :  { %v1749_v4 = vpop.eup %1748 }
0x103c   :  { %v1751_v42 = vpop.eup %1750  ;;  %1366 = vst [vmem:[%s2115_s6] sm:$0xff] %v1749_v4 }
0x103d   :  { %1367 = vst [vmem:[%s2115_s6 + $0x8] sm:$0xff] %v1751_v42 }
0x103e   :  { %1372 = vsyncpa [#allocation4], 1 }
0x103f   :  { %1373 = vsyncpa [#allocation6], 1 }

</bundles_post_ra>
